<compile_context>
chip_gen: v5e
topology: v5e:2x2
jax: 0.10.0
libtpu: 0.0.40
codegen_flags: <defaults>
</compile_context>

<pallas_src>
import functools

import jax
import jax.numpy as jnp
from jax.experimental import pallas as pl
from jax.experimental.pallas import tpu as pltpu


def _actor_kernel(
    state_ref,        # (tb, D_in)  f32
    w1_ref, b1_ref,   # (D_in, H) bf16, (1, H) f32
    w2_ref, b2_ref,   # (H, H)   bf16, (1, H) f32
    w3_ref, b3_ref,   # (H, H)   bf16, (1, H) f32
    w4_ref, b4_ref,   # (H, 2A)  bf16, (1, 2A) f32   (fused mean|log_std head)
    out_ref,          # (tb, 2A) f32  -> [mean | clamped log_std]
    *,
    act_size,
):
    # bf16 operands on the MXU, f32 accumulation; f32 elementwise on the VPU.
    x = state_ref[...].astype(jnp.bfloat16)
    h = jnp.dot(x, w1_ref[...], preferred_element_type=jnp.float32) + b1_ref[...]
    h = jnp.maximum(h, 0.0)

    h = jnp.dot(h.astype(jnp.bfloat16), w2_ref[...],
                preferred_element_type=jnp.float32) + b2_ref[...]
    h = jnp.maximum(h, 0.0)

    h = jnp.dot(h.astype(jnp.bfloat16), w3_ref[...],
                preferred_element_type=jnp.float32) + b3_ref[...]
    h = jnp.maximum(h, 0.0)

    y = jnp.dot(h.astype(jnp.bfloat16), w4_ref[...],
                preferred_element_type=jnp.float32) + b4_ref[...]

    # Clamp only the log_std half (columns >= act_size) to [-20, 2].
    col = jax.lax.broadcasted_iota(jnp.int32, y.shape, 1)
    y = jnp.where(col >= act_size, jnp.clip(y, -20.0, 2.0), y)

    out_ref[...] = y.astype(out_ref.dtype)


def actor_forward(state, kernel_params, act_size, *, batch_tile=256):
    """state: (B, linear_output) f32. kernel_params: output of prepare_actor_params.

    Returns (mean, log_std), each (B, act_size) f32.
    """
    w1, b1, w2, b2, w3, b3, w4, b4 = kernel_params
    B, d_in = state.shape
    out_cols = w4.shape[1]  # 2 * act_size

    kern = functools.partial(_actor_kernel, act_size=act_size)
    out_shape = jax.ShapeDtypeStruct((B, out_cols), jnp.float32)

    if B >= batch_tile and B % batch_tile == 0:
        # Batch-tiled path: rows sharded across the grid ("parallel" -> both TCs
        # on v7x); weights/biases pinned to block (0, 0) so they stay resident.
        tb = batch_tile

        def resident(a):
            return pl.BlockSpec(a.shape, lambda i, _nd=a.ndim: (0,) * _nd)

        out = pl.pallas_call(
            kern,
            out_shape=out_shape,
            grid=(B // tb,),
            in_specs=[
                pl.BlockSpec((tb, d_in), lambda i: (i, 0)),
                resident(w1), resident(b1),
                resident(w2), resident(b2),
                resident(w3), resident(b3),
                resident(w4), resident(b4),
            ],
            out_specs=pl.BlockSpec((tb, out_cols), lambda i: (i, 0)),
            compiler_params=pltpu.CompilerParams(
                dimension_semantics=("parallel",)),
        )(state, w1, b1, w2, b2, w3, b3, w4, b4)
    else:
        # Small batch: one grid point, everything whole-array in VMEM.
        vmem = pl.BlockSpec(memory_space=pltpu.MemorySpace.VMEM)
        out = pl.pallas_call(
            kern,
            out_shape=out_shape,
            in_specs=[vmem] * 9,
            out_specs=vmem,
        )(state, w1, b1, w2, b2, w3, b3, w4, b4)

    mean = out[:, :act_size]
    log_std = out[:, act_size:]
    return mean, log_std


def init_actor_params(key, linear_output, act_size, hidden_size, init_w=0.003):
    """PyTorch-layout f32 params (w: (out, in), b: (out,)) mirroring nn.Linear
    default init + final-layer uniform(-init_w, init_w)."""
    ks = jax.random.split(key, 8)

    def linear(kw, kb, fan_in, fan_out, bound=None):
        if bound is None:
            bound = 1.0 / jnp.sqrt(fan_in)
        w = jax.random.uniform(kw, (fan_out, fan_in), jnp.float32, -bound, bound)
        b = jax.random.uniform(kb, (fan_out,), jnp.float32, -bound, bound)
        return w, b

    w1, b1 = linear(ks[0], ks[1], linear_output, hidden_size)
    w2, b2 = linear(ks[2], ks[3], hidden_size, hidden_size)
    w3, b3 = linear(ks[4], ks[5], hidden_size, hidden_size)
    w4, b4 = linear(ks[6], ks[7], hidden_size, act_size * 2, bound=init_w)
    return (w1, b1, w2, b2, w3, b3, w4, b4)


def prepare_actor_params(raw_params):
    """One-time conversion to kernel layout: (in, out) bf16 weights, (1, out) f32
    biases. Call once after init / param update — NOT on every forward."""
    w1, b1, w2, b2, w3, b3, w4, b4 = raw_params
    to_w = lambda w: jnp.asarray(w.T, dtype=jnp.bfloat16)
    to_b = lambda b: jnp.asarray(b, dtype=jnp.float32).reshape(1, -1)
    return (to_w(w1), to_b(b1), to_w(w2), to_b(b2),
            to_w(w3), to_b(b3), to_w(w4), to_b(b4))


def _reference_forward_f32(state, raw_params, act_size):
    """Pure-f32 reference matching the PyTorch module semantics."""
    w1, b1, w2, b2, w3, b3, w4, b4 = raw_params
    h = jnp.maximum(state @ w1.T + b1, 0.0)
    h = jnp.maximum(h @ w2.T + b2, 0.0)
    h = jnp.maximum(h @ w3.T + b3, 0.0)
    y = h @ w4.T + b4
    return y[:, :act_size], jnp.clip(y[:, act_size:], -20.0, 2.0)


def _reference_forward_bf16(state, raw_params, act_size):
    """Reference emulating the kernel's numerics (bf16 operands, f32 accumulate)."""
    w1, b1, w2, b2, w3, b3, w4, b4 = raw_params

    def lin(x, w, b):
        return jnp.dot(x.astype(jnp.bfloat16), w.T.astype(jnp.bfloat16),
                       preferred_element_type=jnp.float32) + b

    h = jnp.maximum(lin(state, w1, b1), 0.0)
    h = jnp.maximum(lin(h, w2, b2), 0.0)
    h = jnp.maximum(lin(h, w3, b3), 0.0)
    y = lin(h, w4, b4)
    return y[:, :act_size], jnp.clip(y[:, act_size:], -20.0, 2.0)


if __name__ == "__main__":
    key = jax.random.PRNGKey(0)
    k_param, k_state, k_state_big = jax.random.split(key, 3)

    batch = 2
    linear_output = 32   # flattened-feature size feeding the Actor
    act_size = 4
    hidden_size = 32

    raw_params = init_actor_params(k_param, linear_output, act_size, hidden_size)
    params = prepare_actor_params(raw_params)  # hoisted layout/dtype conversion

    # --- small-batch path (single VMEM block) ---
    state = jax.random.normal(k_state, (batch, linear_output), jnp.float32)
    mean, log_std = actor_forward(state, params, act_size)
    jax.block_until_ready((mean, log_std))

    assert mean.shape == (batch, act_size)
    assert log_std.shape == (batch, act_size)

    ref_mean, ref_log_std = _reference_forward_bf16(state, raw_params, act_size)
    assert jnp.allclose(mean, ref_mean, atol=2e-3, rtol=2e-3)
    assert jnp.allclose(log_std, ref_log_std, atol=2e-3, rtol=2e-3)

    f32_mean, f32_log_std = _reference_forward_f32(state, raw_params, act_size)
    assert jnp.allclose(mean, f32_mean, atol=5e-2, rtol=5e-2)
    assert jnp.allclose(log_std, f32_log_std, atol=5e-2, rtol=5e-2)

    # --- batch-tiled path (exercises the "parallel" grid used on v7x) ---
    big_batch = 512
    state_big = jax.random.normal(k_state_big, (big_batch, linear_output), jnp.float32)
    mean_b, log_std_b = actor_forward(state_big, params, act_size)
    jax.block_until_ready((mean_b, log_std_b))

    ref_mean_b, ref_log_std_b = _reference_forward_bf16(state_big, raw_params, act_size)
    assert mean_b.shape == (big_batch, act_size)
    assert jnp.allclose(mean_b, ref_mean_b, atol=2e-3, rtol=2e-3)
    assert jnp.allclose(log_std_b, ref_log_std_b, atol=2e-3, rtol=2e-3)

    print("KERNEL_OK")
</pallas_src>

<mosaic_0001>
module attributes {stable_mosaic.version = 11 : i64} {
  func.func @_actor_kernel(%arg0: memref<2x32xf32, #tpu.memory_space<vmem>>, %arg1: memref<32x32xbf16, #tpu.memory_space<vmem>>, %arg2: memref<1x32xf32, #tpu.memory_space<vmem>>, %arg3: memref<32x32xbf16, #tpu.memory_space<vmem>>, %arg4: memref<1x32xf32, #tpu.memory_space<vmem>>, %arg5: memref<32x32xbf16, #tpu.memory_space<vmem>>, %arg6: memref<1x32xf32, #tpu.memory_space<vmem>>, %arg7: memref<32x8xbf16, #tpu.memory_space<vmem>>, %arg8: memref<1x8xf32, #tpu.memory_space<vmem>>, %arg9: memref<2x8xf32, #tpu.memory_space<vmem>>) attributes {dimension_semantics = [], scalar_prefetch = 0 : i64, scratch_operands = 0 : i64, tpu.core_type = #tpu.core_type<tc>} {
    %c0 = arith.constant 0 : index
    %c0_0 = arith.constant 0 : index
    %0 = vector.load %arg0[%c0, %c0_0] : memref<2x32xf32, #tpu.memory_space<vmem>>, vector<2x32xf32>
    %1 = arith.truncf %0 : vector<2x32xf32> to vector<2x32xbf16>
    %c0_1 = arith.constant 0 : index
    %c0_2 = arith.constant 0 : index
    %2 = vector.load %arg1[%c0_1, %c0_2] : memref<32x32xbf16, #tpu.memory_space<vmem>>, vector<32x32xbf16>
    %cst = arith.constant dense<0.000000e+00> : vector<2x32xf32>
    %3 = tpu.matmul %1, %2, %cst {dimension_numbers = #tpu.dot_dimension_numbers<[1], [0], [0], [1], [0, 0, 1, 1], [], []>} : vector<2x32xbf16>, vector<32x32xbf16>, vector<2x32xf32> -> vector<2x32xf32>
    %c0_3 = arith.constant 0 : index
    %c0_4 = arith.constant 0 : index
    %4 = vector.load %arg2[%c0_3, %c0_4] : memref<1x32xf32, #tpu.memory_space<vmem>>, vector<1x32xf32>
    %5 = vector.broadcast %4 : vector<1x32xf32> to vector<2x32xf32>
    %6 = arith.addf %3, %5 : vector<2x32xf32>
    %cst_5 = arith.constant 0.000000e+00 : f32
    %7 = vector.broadcast %cst_5 : f32 to vector<2x32xf32>
    %8 = arith.maximumf %6, %7 : vector<2x32xf32>
    %9 = arith.truncf %8 : vector<2x32xf32> to vector<2x32xbf16>
    %c0_6 = arith.constant 0 : index
    %c0_7 = arith.constant 0 : index
    %10 = vector.load %arg3[%c0_6, %c0_7] : memref<32x32xbf16, #tpu.memory_space<vmem>>, vector<32x32xbf16>
    %cst_8 = arith.constant dense<0.000000e+00> : vector<2x32xf32>
    %11 = tpu.matmul %9, %10, %cst_8 {dimension_numbers = #tpu.dot_dimension_numbers<[1], [0], [0], [1], [0, 0, 1, 1], [], []>} : vector<2x32xbf16>, vector<32x32xbf16>, vector<2x32xf32> -> vector<2x32xf32>
    %c0_9 = arith.constant 0 : index
    %c0_10 = arith.constant 0 : index
    %12 = vector.load %arg4[%c0_9, %c0_10] : memref<1x32xf32, #tpu.memory_space<vmem>>, vector<1x32xf32>
    %13 = vector.broadcast %12 : vector<1x32xf32> to vector<2x32xf32>
    %14 = arith.addf %11, %13 : vector<2x32xf32>
    %cst_11 = arith.constant 0.000000e+00 : f32
    %15 = vector.broadcast %cst_11 : f32 to vector<2x32xf32>
    %16 = arith.maximumf %14, %15 : vector<2x32xf32>
    %17 = arith.truncf %16 : vector<2x32xf32> to vector<2x32xbf16>
    %c0_12 = arith.constant 0 : index
    %c0_13 = arith.constant 0 : index
    %18 = vector.load %arg5[%c0_12, %c0_13] : memref<32x32xbf16, #tpu.memory_space<vmem>>, vector<32x32xbf16>
    %cst_14 = arith.constant dense<0.000000e+00> : vector<2x32xf32>
    %19 = tpu.matmul %17, %18, %cst_14 {dimension_numbers = #tpu.dot_dimension_numbers<[1], [0], [0], [1], [0, 0, 1, 1], [], []>} : vector<2x32xbf16>, vector<32x32xbf16>, vector<2x32xf32> -> vector<2x32xf32>
    %c0_15 = arith.constant 0 : index
    %c0_16 = arith.constant 0 : index
    %20 = vector.load %arg6[%c0_15, %c0_16] : memref<1x32xf32, #tpu.memory_space<vmem>>, vector<1x32xf32>
    %21 = vector.broadcast %20 : vector<1x32xf32> to vector<2x32xf32>
    %22 = arith.addf %19, %21 : vector<2x32xf32>
    %cst_17 = arith.constant 0.000000e+00 : f32
    %23 = vector.broadcast %cst_17 : f32 to vector<2x32xf32>
    %24 = arith.maximumf %22, %23 : vector<2x32xf32>
    %25 = arith.truncf %24 : vector<2x32xf32> to vector<2x32xbf16>
    %c0_18 = arith.constant 0 : index
    %c0_19 = arith.constant 0 : index
    %26 = vector.load %arg7[%c0_18, %c0_19] : memref<32x8xbf16, #tpu.memory_space<vmem>>, vector<32x8xbf16>
    %cst_20 = arith.constant dense<0.000000e+00> : vector<2x8xf32>
    %27 = tpu.matmul %25, %26, %cst_20 {dimension_numbers = #tpu.dot_dimension_numbers<[1], [0], [0], [1], [0, 0, 1, 1], [], []>} : vector<2x32xbf16>, vector<32x8xbf16>, vector<2x8xf32> -> vector<2x8xf32>
    %c0_21 = arith.constant 0 : index
    %c0_22 = arith.constant 0 : index
    %28 = vector.load %arg8[%c0_21, %c0_22] : memref<1x8xf32, #tpu.memory_space<vmem>>, vector<1x8xf32>
    %29 = vector.broadcast %28 : vector<1x8xf32> to vector<2x8xf32>
    %30 = arith.addf %27, %29 : vector<2x8xf32>
    %31 = tpu.iota {dimensions = array<i32: 1>} : vector<2x8xi32>
    %c4_i32 = arith.constant 4 : i32
    %32 = vector.broadcast %c4_i32 : i32 to vector<2x8xi32>
    %33 = arith.cmpi sge, %31, %32 : vector<2x8xi32>
    %cst_23 = arith.constant -2.000000e+01 : f32
    %cst_24 = arith.constant 2.000000e+00 : f32
    %34 = vector.broadcast %cst_23 : f32 to vector<2x8xf32>
    %35 = arith.maximumf %34, %30 : vector<2x8xf32>
    %36 = vector.broadcast %cst_24 : f32 to vector<2x8xf32>
    %37 = arith.minimumf %36, %35 : vector<2x8xf32>
    %38 = arith.select %33, %37, %30 : vector<2x8xi1>, vector<2x8xf32>
    %c0_25 = arith.constant 0 : index
    %c0_26 = arith.constant 0 : index
    %39 = vector.load %arg9[%c0_25, %c0_26] : memref<2x8xf32, #tpu.memory_space<vmem>>, vector<2x8xf32>
    tpu.vector_store %arg9[%c0_25, %c0_26], %38 {strides = array<i32>} : memref<2x8xf32, #tpu.memory_space<vmem>>, vector<2x8xf32>,
    return
  }
}

</mosaic_0001>

<bundles_post_ra>
// kernel: tpu_custom_call.1
= control target key start
LH: loop header
LB: loop body
LE: loop exit
PB: predicated region body
PF: predicated region fallthrough
CT: control target
= control target key end

     0   :  { %14 = vsyncpa [#allocation3], 0  ;;  %s471_s0 = inlined_call_operand.vmem [shape: f32[2,32], index: 0, kind: input, shape index: {}]   ;;  %s472_s1 = inlined_call_operand.vmem [shape: bf16[32,32], index: 1, kind: input, shape index: {}]   ;;  %s473_s2 = inlined_call_operand.vmem [shape: f32[1,32], index: 2, kind: input, shape index: {}]   ;;  %s474_s3 = inlined_call_operand.hbm [shape: bf16[32,32], index: 3, kind: input, shape index: {}]   ;;  %s475_s4 = inlined_call_operand.vmem [shape: f32[1,32], index: 4, kind: input, shape index: {}]   ;;  %s476_s5 = inlined_call_operand.hbm [shape: bf16[32,32], index: 5, kind: input, shape index: {}]   ;;  %s477_s6 = inlined_call_operand.vmem [shape: f32[1,32], index: 6, kind: input, shape index: {}]   ;;  %s478_s7 = inlined_call_operand.vmem [shape: bf16[32,8], index: 7, kind: input, shape index: {}]   ;;  %s479_s8 = inlined_call_operand.vmem [shape: f32[1,8], index: 8, kind: input, shape index: {}]   ;;  %s480_s9 = inlined_call_operand.hbm [shape: f32[2,8], index: 9, kind: output, shape index: {}]  }
   0x1   :  { %15 = vsyncpa [#allocation6], 0 }
   0x2   :  { %16 = vsyncpa [#allocation4], 0  ;;  %s27_s11 = sshll.u32 %s474_s3, 4  ;;  %s376_s12 = smov [#allocation2]   ;;  %s28_s11 = int_to_ptr.hbm [resolvable:$true] %s27_s11 }
   0x3   :  { %s29_s13 = sshll.u32 %s376_s12, 4  ;;  %s42_s16 = sshll.u32 %s476_s5, 4  ;;  %s30_s13 = int_to_ptr.vmem [resolvable:$true] %s29_s13  ;;  %s43_s16 = int_to_ptr.hbm [resolvable:$true] %s42_s16 }
   0x4   :  { %s377_s17 = smov 64   ;;  %s378_s18 = smov 4  }
   0x5   :  { %35 = dma.hbm_to_vmem [thread:$0]  %s28_s11, 256, %s30_s13, [#allocation3], %s377_s17, %s377_s17, %s378_s18  }
   0x6   :  { %s379_s19 = smov [#allocation5]  }
   0x7   :  { %s44_s20 = sshll.u32 %s379_s19, 4  ;;  %s45_s20 = int_to_ptr.vmem [resolvable:$true] %s44_s20 }
   0x8   :  { %50 = dma.hbm_to_vmem [thread:$0]  %s43_s16, 256, %s45_s20, [#allocation6], %s377_s17, %s377_s17, %s378_s18  }
   0x9   :  { %370 = dma.done.wait [#allocation3], 256  }
   0xa   :  { %371 = vsyncadd [#allocation3], 4294967040 }
   0xb   :  { %372 = dma.done.wait [#allocation6], 256  }
   0xc   :  { %373 = vsyncadd [#allocation6], 4294967040  ;;  %v282_v0 = vld [vmem:[%s472_s1 + $0x8] sm:$0xff]  ;;  %v281_v1 = vld [vmem:[%s472_s1] sm:$0xff]  ;;  %vm88_vm0 = vcmask 261120   ;;  %v219_v28 = vlaneseq  ;;  %s234_s14 = sshll.u32 %s480_s9, 4  ;;  %s235_s14 = int_to_ptr.hbm [resolvable:$true] %s234_s14 }
   0xd   :  { %98 = vmatpush.bf16.msra.mxu0 %v282_v0  ;;  %v66_v2 = vld [vmem:[%s471_s0] sm:$0x3]  ;;  %v284_v4 = vld [vmem:[#allocation2 + $0x8] sm:$0xff]  ;;  %v286_v12 = vld [vmem:[#allocation5 + $0x8] sm:$0xff]  ;;  %vm225_vm2 = vcmask 58368  }
   0xe   :  { %v67_v3 = vpack.c.bf16 %v66_v2, %v66_v2  ;;  %136 = vmatpush.bf16.msra.mxu1 %v284_v4  ;;  %v283_v5 = vld [vmem:[#allocation2] sm:$0xff]  ;;  %174 = vmatpush.bf16.msra.mxu2 %v286_v12  ;;  %v285_v13 = vld [vmem:[#allocation5] sm:$0xff]  ;;  %v288_v20 = vld [vmem:[%s478_s7 + $0x8] sm:$0xff]  ;;  %v220_v31 = vand.u32 127, %v219_v28 }
   0xf   :  { %v294_v6 = vld [vmem:[%s473_s2] ss:$0 sm:$0xff]  ;;  %212 = vmatpush.bf16.msra.mxu3 %v288_v20 }
  0x10   :  { %v295_v14 = vld [vmem:[%s475_s4] ss:$0 sm:$0xff]  ;;  %vm221_vm1 = vcmp.ge.s32.totalorder %v220_v31, 4 }
  0x11   :  { %99 = vmatpush.bf16.msra.mxu0 %v281_v1  ;;  %v287_v21 = vld [vmem:[%s478_s7] sm:$0xff]  ;;  %s380_s7 = smov [#allocation7]  }
  0x12   :  { %137 = vmatpush.bf16.msra.mxu1 %v283_v5  ;;  %175 = vmatpush.bf16.msra.mxu2 %v285_v13  ;;  %v296_v22 = vld [vmem:[%s477_s6] ss:$0 sm:$0xff]  ;;  %s232_s12 = sshll.u32 %s380_s7, 4  ;;  %s233_s12 = int_to_ptr.vmem [resolvable:$true] %s232_s12 }
  0x13   :  { %213 = vmatpush.bf16.msra.mxu3 %v287_v21  ;;  %v297_v29 = vld [vmem:[%s479_s8] ss:$0 sm:$0xff] }
  0x14   :  { %253 = vmatmul.msk.bf16.vlgmr.msra.gmra.mxu0 %vm88_vm0, %v67_v3 }
  0x91   :  { %v101_v7 = vpop.f32.mrf.mxu0 }
  0x92   :  { %v102_v8 = vadd.f32 %v294_v6, %v101_v7 }
  0x94   :  { %v105_v9 = vmax.f32 %v102_v8, 0.0 }
  0x96   :  { %v106_v10 = vpack.c.bf16 %v105_v9, %v105_v9 }
  0x98   :  { %262 = vmatmul.msk.bf16.vlgmr.msra.gmra.mxu1 %vm88_vm0, %v106_v10 }
  0x99   :  { %v103_v11 = vpop.f32.mrf.mxu0 }
 0x115   :  { %v139_v15 = vpop.f32.mrf.mxu1 }
 0x116   :  { %v140_v16 = vadd.f32 %v295_v14, %v139_v15 }
 0x118   :  { %v143_v17 = vmax.f32 %v140_v16, 0.0 }
 0x11a   :  { %v144_v18 = vpack.c.bf16 %v143_v17, %v143_v17 }
 0x11c   :  { %271 = vmatmul.msk.bf16.vlgmr.msra.gmra.mxu2 %vm88_vm0, %v144_v18 }
 0x11d   :  { %v141_v19 = vpop.f32.mrf.mxu1 }
 0x19f   :  { %v177_v23 = vpop.f32.mrf.mxu2 }
 0x1a0   :  { %v178_v24 = vadd.f32 %v296_v22, %v177_v23 }
 0x1a2   :  { %v181_v25 = vmax.f32 %v178_v24, 0.0 }
 0x1a4   :  { %v182_v26 = vpack.c.bf16 %v181_v25, %v181_v25 }
 0x1a6   :  { %280 = vmatmul.msk.bf16.vlgmr.msra.gmra.mxu3 %vm88_vm0, %v182_v26 }
 0x1a7   :  { %v179_v27 = vpop.f32.mrf.mxu2 }
 0x229   :  { %v215_v30 = vpop.f32.mrf.mxu3 }
 0x22a   :  { %v216_v32 = vadd.f32 %v297_v29, %v215_v30 }
 0x22c   :  { %v222_v33 = vmax.f32 %v216_v32, -20.0 }
 0x22e   :  { %v223_v34 = vmin.f32 %v222_v33, 2.0 }
 0x230   :  { %v224_v35 = vsel %vm221_vm1, %v223_v34, %v216_v32 }
 0x231   :  { %v217_v36 = vpop.f32.mrf.mxu3  ;;  %226 = vst.msk [vmem:[#allocation7] sm:$0x3] %vm225_vm2, %v224_v35 }
 0x232   :  { %237 = dma.vmem_to_hbm [thread:$0]  %s233_s12, 32, %s235_s14, [#allocation4]  }
 0x233   :  { %374 = dma.done.wait [#allocation4], 32  }
 0x234   :  { %375 = vsyncadd [#allocation4], 4294967264 }
 0x235   :  { %242 = vsyncpa [#allocation3], 1 }
 0x236   :  { %243 = vsyncpa [#allocation6], 1 }
 0x237   :  { %244 = vsyncpa [#allocation4], 1 }

</bundles_post_ra>
